<compile_context>
chip_gen: v7x
topology: tpu7x:2x2x1
jax: 0.10.0
libtpu: 0.0.40
codegen_flags: <defaults>
</compile_context>

<pallas_src>
import jax
import jax.numpy as jnp
from jax.experimental import pallas as pl
from jax.experimental.pallas import tpu as pltpu

LN_EPS = 1e-12  # matches nn.LayerNorm(hidden_dim, eps=1e-12)


def _state_pre_encoder_kernel(x_ref, wc_ref, bc_ref, g_ref, beta_ref,
                              bones_ref, o_ref):
    # x_ref:     (tm, P*F)    packed input rows (P original rows per lane-row)
    # wc_ref:    (P*F, P*H)   mean-centered block-diagonal weights, f32
    # bc_ref:    (1, P*H)     mean-centered bias (tiled P times), f32
    # g_ref:     (1, P*H)     LayerNorm gamma tiled, f32
    # beta_ref:  (1, P*H)     LayerNorm beta tiled, f32
    # bones_ref: (P*H, P*H)   block-ones / H (variance reduce+broadcast), f32
    # o_ref:     (tm, P*H)    packed output rows (lane-dense, unmasked stores)
    x = x_ref[...]
    if x.dtype != jnp.float32:        # keep all math / LN statistics in f32
        x = x.astype(jnp.float32)

    # Linear + mean subtraction in a single MXU matmul (centering folded into W).
    centered = jnp.dot(x, wc_ref[...],
                       preferred_element_type=jnp.float32) + bc_ref[...]

    # Per-segment variance (reduce + broadcast) in one MXU matmul; 1/H is
    # already folded into bones_ref.
    bvar = jnp.dot(centered * centered, bones_ref[...],
                   preferred_element_type=jnp.float32)
    inv_std = jax.lax.rsqrt(bvar + LN_EPS)      # EUP slot — effectively free

    o_ref[...] = (centered * inv_std * g_ref[...] + beta_ref[...]).astype(o_ref.dtype)


def state_pre_encoder(feature_seq, weight, bias, gamma, beta, *, tm_packed=2048):
    """feature_seq: (B, S, F); weight: (H, F); bias/gamma/beta: (H,)."""
    B, S, F = feature_seq.shape
    H = weight.shape[0]
    M = B * S

    # Pack P consecutive rows into one 128-lane row when H divides 128 (H=32 -> P=4).
    P = 128 // H if (H < 128 and 128 % H == 0) else 1
    PF, PH = P * F, P * H

    # Pad only to a multiple of P (needed for the packed reshape); no pad when
    # M % P == 0.  Partial last grid blocks are masked by Pallas.
    mp_needed = pl.cdiv(M, P)
    m_for_pack = mp_needed * P
    x2d = feature_seq.reshape(M, F)
    if m_for_pack != M:
        x2d = jnp.pad(x2d, ((0, m_for_pack - M), (0, 0)))
    x_packed = x2d.reshape(mp_needed, PF)

    # Row-tile size (in packed rows): multiple of 8, capped so large inputs get
    # at least 2 grid steps (v7x megacore); tiny inputs use the full extent.
    def _round8(n):
        return ((n + 7) // 8) * 8

    if mp_needed <= 8:
        tm = mp_needed                      # block == full array extent (valid)
    else:
        tm = min(int(tm_packed), _round8(pl.cdiv(mp_needed, 2)))
    num_tiles = pl.cdiv(mp_needed, tm)

    # Precompute resident constants (all f32).
    f32 = jnp.float32
    eye_p = jnp.eye(P, dtype=f32)
    w_packed = jnp.kron(eye_p, weight.astype(f32).T)                     # (PF, PH)
    b_packed = jnp.tile(bias.astype(f32), P).reshape(1, PH)              # (1, PH)
    block_ones = jnp.kron(eye_p, jnp.ones((H, H), dtype=f32)) / f32(H)   # (PH, PH)
    center = jnp.eye(PH, dtype=f32) - block_ones                         # (PH, PH)
    w_c = w_packed @ center                                              # (PF, PH)
    b_c = b_packed @ center                                              # (1, PH)
    g_packed = jnp.tile(gamma.astype(f32), P).reshape(1, PH)
    beta_packed = jnp.tile(beta.astype(f32), P).reshape(1, PH)

    out_packed = pl.pallas_call(
        _state_pre_encoder_kernel,
        out_shape=jax.ShapeDtypeStruct((mp_needed, PH), feature_seq.dtype),
        grid_spec=pltpu.PrefetchScalarGridSpec(
            num_scalar_prefetch=0,
            grid=(num_tiles,),
            in_specs=[
                pl.BlockSpec((tm, PF), lambda i: (i, 0)),   # packed input tile
                pl.BlockSpec((PF, PH), lambda i: (0, 0)),   # centered weights (resident)
                pl.BlockSpec((1, PH), lambda i: (0, 0)),    # centered bias
                pl.BlockSpec((1, PH), lambda i: (0, 0)),    # gamma
                pl.BlockSpec((1, PH), lambda i: (0, 0)),    # beta
                pl.BlockSpec((PH, PH), lambda i: (0, 0)),   # block-ones / H
            ],
            out_specs=pl.BlockSpec((tm, PH), lambda i: (i, 0)),
        ),
        compiler_params=pltpu.CompilerParams(
            # Independent row tiles: multi-step grids shard across v7x's 2 TCs.
            dimension_semantics=("parallel",),
            # Generation-safe scoped-VMEM budget (v7x physical = 64 MiB).
            vmem_limit_bytes=32 * 1024 * 1024,
        ),
    )(x_packed, w_c, b_c, g_packed, beta_packed, block_ones)

    out = out_packed.reshape(m_for_pack, H)
    if m_for_pack != M:
        out = out[:M]
    return out.reshape(B, S, H)


def _reference(feature_seq, weight, bias, gamma, beta):
    y = jnp.einsum("bsf,hf->bsh", feature_seq.astype(jnp.float32),
                   weight.astype(jnp.float32)) + bias.astype(jnp.float32)
    mean = jnp.mean(y, axis=-1, keepdims=True)
    var = jnp.mean((y - mean) ** 2, axis=-1, keepdims=True)
    return ((y - mean) / jnp.sqrt(var + LN_EPS)) * gamma + beta


if __name__ == "__main__":
    # Shapes implied by the module: feature_num=4, hidden_dim=32,
    # feature_seq of shape (batch=2, seq=8, feature_num=4).
    B, S, F, H = 2, 8, 4, 32

    key = jax.random.PRNGKey(0)
    k_x, k_w, k_b = jax.random.split(key, 3)

    feature_seq = jax.random.normal(k_x, (B, S, F), dtype=jnp.float32)
    weight = jax.random.normal(k_w, (H, F), dtype=jnp.float32) * 0.1
    bias = jax.random.normal(k_b, (H,), dtype=jnp.float32) * 0.01
    gamma = jnp.ones((H,), dtype=jnp.float32)
    beta = jnp.zeros((H,), dtype=jnp.float32)

    out = state_pre_encoder(feature_seq, weight, bias, gamma, beta)
    out = jax.block_until_ready(out)

    ref = _reference(feature_seq, weight, bias, gamma, beta)
    assert out.shape == (B, S, H)
    assert jnp.allclose(out, ref, atol=1e-4, rtol=1e-4), "mismatch vs reference"

    print("KERNEL_OK")
</pallas_src>

<mosaic_0001>
module attributes {stable_mosaic.version = 11 : i64} {
  func.func @_state_pre_encoder_kernel(%arg0: i32, %arg1: memref<4x16xf32, #tpu.memory_space<vmem>>, %arg2: memref<16x128xf32, #tpu.memory_space<vmem>>, %arg3: memref<1x128xf32, #tpu.memory_space<vmem>>, %arg4: memref<1x128xf32, #tpu.memory_space<vmem>>, %arg5: memref<1x128xf32, #tpu.memory_space<vmem>>, %arg6: memref<128x128xf32, #tpu.memory_space<vmem>>, %arg7: memref<4x128xf32, #tpu.memory_space<vmem>>) attributes {dimension_semantics = [#tpu.dimension_semantics<parallel>], iteration_bounds = array<i64: 1>, scalar_prefetch = 0 : i64, scratch_operands = 0 : i64, tpu.core_type = #tpu.core_type<tc>, window_params = [{transform_indices = @transform_0, window_bounds = array<i64: 4, 16>}, {pipeline_mode = #tpu.pipeline_mode<synchronous>, transform_indices = @transform_1, window_bounds = array<i64: 16, 128>}, {pipeline_mode = #tpu.pipeline_mode<synchronous>, transform_indices = @transform_2, window_bounds = array<i64: 1, 128>}, {pipeline_mode = #tpu.pipeline_mode<synchronous>, transform_indices = @transform_3, window_bounds = array<i64: 1, 128>}, {pipeline_mode = #tpu.pipeline_mode<synchronous>, transform_indices = @transform_4, window_bounds = array<i64: 1, 128>}, {pipeline_mode = #tpu.pipeline_mode<synchronous>, transform_indices = @transform_5, window_bounds = array<i64: 128, 128>}, {transform_indices = @transform_6, window_bounds = array<i64: 4, 128>}]} {
    %c0 = arith.constant 0 : index
    %c0_0 = arith.constant 0 : index
    %0 = vector.load %arg1[%c0, %c0_0] : memref<4x16xf32, #tpu.memory_space<vmem>>, vector<4x16xf32>
    %c0_1 = arith.constant 0 : index
    %c0_2 = arith.constant 0 : index
    %1 = vector.load %arg2[%c0_1, %c0_2] : memref<16x128xf32, #tpu.memory_space<vmem>>, vector<16x128xf32>
    %cst = arith.constant dense<0.000000e+00> : vector<4x128xf32>
    %2 = tpu.matmul %0, %1, %cst {dimension_numbers = #tpu.dot_dimension_numbers<[1], [0], [0], [1], [0, 0, 1, 1], [], []>} : vector<4x16xf32>, vector<16x128xf32>, vector<4x128xf32> -> vector<4x128xf32>
    %c0_3 = arith.constant 0 : index
    %c0_4 = arith.constant 0 : index
    %3 = vector.load %arg3[%c0_3, %c0_4] : memref<1x128xf32, #tpu.memory_space<vmem>>, vector<1x128xf32>
    %4 = vector.broadcast %3 : vector<1x128xf32> to vector<4x128xf32>
    %5 = arith.addf %2, %4 : vector<4x128xf32>
    %6 = arith.mulf %5, %5 : vector<4x128xf32>
    %c0_5 = arith.constant 0 : index
    %c0_6 = arith.constant 0 : index
    %7 = vector.load %arg6[%c0_5, %c0_6] : memref<128x128xf32, #tpu.memory_space<vmem>>, vector<128x128xf32>
    %cst_7 = arith.constant dense<0.000000e+00> : vector<4x128xf32>
    %8 = tpu.matmul %6, %7, %cst_7 {dimension_numbers = #tpu.dot_dimension_numbers<[1], [0], [0], [1], [0, 0, 1, 1], [], []>} : vector<4x128xf32>, vector<128x128xf32>, vector<4x128xf32> -> vector<4x128xf32>
    %cst_8 = arith.constant 9.99999996E-13 : f32
    %9 = vector.broadcast %cst_8 : f32 to vector<4x128xf32>
    %10 = arith.addf %8, %9 : vector<4x128xf32>
    %11 = math.rsqrt %10 : vector<4x128xf32>
    %12 = arith.mulf %5, %11 : vector<4x128xf32>
    %c0_9 = arith.constant 0 : index
    %c0_10 = arith.constant 0 : index
    %13 = vector.load %arg4[%c0_9, %c0_10] : memref<1x128xf32, #tpu.memory_space<vmem>>, vector<1x128xf32>
    %14 = vector.broadcast %13 : vector<1x128xf32> to vector<4x128xf32>
    %15 = arith.mulf %12, %14 : vector<4x128xf32>
    %c0_11 = arith.constant 0 : index
    %c0_12 = arith.constant 0 : index
    %16 = vector.load %arg5[%c0_11, %c0_12] : memref<1x128xf32, #tpu.memory_space<vmem>>, vector<1x128xf32>
    %17 = vector.broadcast %16 : vector<1x128xf32> to vector<4x128xf32>
    %18 = arith.addf %15, %17 : vector<4x128xf32>
    %c0_13 = arith.constant 0 : index
    %c0_14 = arith.constant 0 : index
    %19 = vector.load %arg7[%c0_13, %c0_14] : memref<4x128xf32, #tpu.memory_space<vmem>>, vector<4x128xf32>
    tpu.vector_store %arg7[%c0_13, %c0_14], %18 {strides = array<i32>} : memref<4x128xf32, #tpu.memory_space<vmem>>, vector<4x128xf32>,
    return
  }
  func.func @transform_0(%arg0: i32) -> (i32, i32) {
    %c0_i32 = arith.constant 0 : i32
    %c0_i32_0 = arith.constant 0 : i32
    return %arg0, %c0_i32 : i32, i32
  }
  func.func @transform_1(%arg0: i32) -> (i32, i32) {
    %c0_i32 = arith.constant 0 : i32
    %c0_i32_0 = arith.constant 0 : i32
    %c0_i32_1 = arith.constant 0 : i32
    return %c0_i32, %c0_i32_0 : i32, i32
  }
  func.func @transform_2(%arg0: i32) -> (i32, i32) {
    %c0_i32 = arith.constant 0 : i32
    %c0_i32_0 = arith.constant 0 : i32
    %c0_i32_1 = arith.constant 0 : i32
    return %c0_i32, %c0_i32_0 : i32, i32
  }
  func.func @transform_3(%arg0: i32) -> (i32, i32) {
    %c0_i32 = arith.constant 0 : i32
    %c0_i32_0 = arith.constant 0 : i32
    %c0_i32_1 = arith.constant 0 : i32
    return %c0_i32, %c0_i32_0 : i32, i32
  }
  func.func @transform_4(%arg0: i32) -> (i32, i32) {
    %c0_i32 = arith.constant 0 : i32
    %c0_i32_0 = arith.constant 0 : i32
    %c0_i32_1 = arith.constant 0 : i32
    return %c0_i32, %c0_i32_0 : i32, i32
  }
  func.func @transform_5(%arg0: i32) -> (i32, i32) {
    %c0_i32 = arith.constant 0 : i32
    %c0_i32_0 = arith.constant 0 : i32
    %c0_i32_1 = arith.constant 0 : i32
    return %c0_i32, %c0_i32_0 : i32, i32
  }
  func.func @transform_6(%arg0: i32) -> (i32, i32) {
    %c0_i32 = arith.constant 0 : i32
    %c0_i32_0 = arith.constant 0 : i32
    return %arg0, %c0_i32 : i32, i32
  }
}

</mosaic_0001>

<bundles_post_ra>
// kernel: tpu_custom_call.1
= control target key start
LH: loop header
LB: loop body
LE: loop exit
PB: predicated region body
PF: predicated region fallthrough
CT: control target
= control target key end

     0   :  { %11 = vsyncpa [#allocation3], 0  ;;  %s574_s0 = inlined_call_operand.hbm [shape: f32[4,16], index: 0, kind: input, shape index: {}]   ;;  %s575_s1 = inlined_call_operand.hbm [shape: f32[16,128], index: 1, kind: input, shape index: {}]   ;;  %s576_s2 = inlined_call_operand.vmem [shape: f32[1,128], index: 2, kind: input, shape index: {}]   ;;  %s577_s3 = inlined_call_operand.vmem [shape: f32[1,128], index: 3, kind: input, shape index: {}]   ;;  %s578_s4 = inlined_call_operand.vmem [shape: f32[1,128], index: 4, kind: input, shape index: {}]   ;;  %s579_s5 = inlined_call_operand.hbm [shape: f32[128,128], index: 5, kind: input, shape index: {}]   ;;  %s580_s6 = inlined_call_operand.hbm [shape: f32[4,128], index: 6, kind: output, shape index: {}]  }
   0x1   :  { %12 = vsyncpa [#allocation6], 0 }
   0x2   :  { %13 = vsyncpa [#allocation4], 0  ;;  %s467_s21 = smov [#allocation5]   ;;  %s373_s25 = scalar_lea.hbm %s575_s1, 256 }
   0x3   :  { %s29_s22 = sshll.u32 %s467_s21, 4  ;;  %p374_p0 = scmp.ne.s32.totalorder %s575_s1, %s373_s25  ;;  %s30_s22 = int_to_ptr.vmem [resolvable:$true] %s29_s22 }
   0x4   :  { %p377_p1 = scmp.lt.u32.totalorder %s373_s25, %s575_s1 }
   0x6   :  { %p379_p2 = pnand %p377_p1, %p374_p0 }
   0x8   :  { %382 = shalt.err (!%p379_p2)
}
   0x9   :  { %s383_s30 = scalar_lea.vmem %s30_s22, 256  ;;  %p388_p4 = scmp.lt.s32.totalorder %s30_s22, %s30_s22 }
   0xa   :  { %p384_p3 = scmp.ne.s32.totalorder %s30_s22, %s383_s30  ;;  %p389_p5 = scmp.lt.s32.totalorder %s383_s30, %s383_s30 }
   0xc   :  { %p390_p6 = por %p389_p5, %p388_p4 }
   0xe   :  { %p391_p7 = pnand %p390_p6, %p384_p3 }
  0x10   :  { %394 = shalt.err (!%p391_p7)
}
  0x11   :  { %s468_s7 = smov 128   ;;  %s469_s8 = smov 8  }
  0x12   :  { %35 = dma.hbm_to_vmem [thread:$0]  %s575_s1, 256, %s30_s22, [#allocation6], %s468_s7, %s468_s7, %s469_s8  }
  0x13   :  { %s470_s11 = smov [#allocation2]   ;;  %s471_s13 = smov [#allocation7]  }
  0x14   :  { %s20_s12 = sshll.u32 %s470_s11, 4  ;;  %s47_s14 = sshll.u32 %s471_s13, 4  ;;  %s21_s12 = int_to_ptr.vmem [resolvable:$true] %s20_s12  ;;  %s48_s14 = int_to_ptr.vmem [resolvable:$true] %s47_s14 }
  0x15   :  { %s395_s17 = scalar_lea.hbm %s574_s0, 64 }
  0x16   :  { %p396_p8 = scmp.ne.s32.totalorder %s574_s0, %s395_s17  ;;  %p399_p9 = scmp.lt.u32.totalorder %s395_s17, %s574_s0 }
  0x18   :  { %p401_p10 = pnand %p399_p9, %p396_p8 }
  0x1a   :  { %404 = shalt.err (!%p401_p10)
}
  0x1b   :  { %s405_s1 = scalar_lea.vmem %s21_s12, 64  ;;  %p410_p12 = scmp.lt.s32.totalorder %s21_s12, %s21_s12 }
  0x1c   :  { %p406_p11 = scmp.ne.s32.totalorder %s21_s12, %s405_s1  ;;  %p411_p13 = scmp.lt.s32.totalorder %s405_s1, %s405_s1 }
  0x1e   :  { %p412_p0 = por %p411_p13, %p410_p12 }
  0x20   :  { %p413_p1 = pnand %p412_p0, %p406_p11 }
  0x22   :  { %416 = shalt.err (!%p413_p1)
}
  0x23   :  { %23 = dma.hbm_to_vmem [thread:$0]  %s574_s0, 64, %s21_s12, [#allocation3]  }
  0x24   :  { %s417_s26 = scalar_lea.hbm %s579_s5, 2048 }
  0x25   :  { %p418_p2 = scmp.ne.s32.totalorder %s579_s5, %s417_s26  ;;  %p421_p3 = scmp.lt.u32.totalorder %s417_s26, %s579_s5 }
  0x27   :  { %p423_p4 = pnand %p421_p3, %p418_p2 }
  0x29   :  { %426 = shalt.err (!%p423_p4)
}
  0x2a   :  { %s427_s9 = scalar_lea.vmem %s48_s14, 2048  ;;  %p432_p6 = scmp.lt.s32.totalorder %s48_s14, %s48_s14 }
  0x2b   :  { %p428_p5 = scmp.ne.s32.totalorder %s48_s14, %s427_s9  ;;  %p433_p7 = scmp.lt.s32.totalorder %s427_s9, %s427_s9 }
  0x2d   :  { %p434_p8 = por %p433_p7, %p432_p6 }
  0x2f   :  { %p435_p9 = pnand %p434_p8, %p428_p5 }
  0x31   :  { %438 = shalt.err (!%p435_p9)
}
  0x32   :  { %53 = dma.hbm_to_vmem [thread:$0]  %s579_s5, 2048, %s48_s14, [#allocation6], %s468_s7, %s468_s7, %s469_s8  }
  0x33   :  { %461 = dma.done.wait [#allocation3], 64  }
  0x34   :  { %462 = vsyncadd [#allocation3], 4294967232 }
  0x35   :  { %463 = dma.done.wait [#allocation6], 2304  }
  0x36   :  { %464 = vsyncadd [#allocation6], 4294964992  ;;  %v472_v0 = vmov 0.0|0.0   ;;  %vm473_vm0 = vmmov 0   ;;  %v474_v1 = vmov 0.0   ;;  %v64_v2 = vld [vmem:[#allocation5] sm:$0xff] }
  0x37   :  { %335 = vmatprep.subr.bf16.mxu0 %v472_v0  ;;  %297 = vmatprep.mubr.msk.f32.mxu0 %vm473_vm0, %v474_v1  ;;  %v65_v3 = vld [vmem:[#allocation5 + $0x8] sm:$0xff]  ;;  %v148_v5 = vld [vmem:[#allocation7] sm:$0xff]  ;;  %v149_v6 = vld [vmem:[#allocation7 + $0x8] sm:$0xff]  ;;  %vm73_vm1 = vcmask 130048  }
  0x38   :  { %338 = vmatprep.subr.bf16.mxu1 %v472_v0  ;;  %332 = vmatprep.mubr.msk.f32.mxu1 %vm473_vm0, %v474_v1  ;;  %v336_v4 = vpack.c.bf16 %v65_v3, %v64_v2  ;;  %v150_v7 = vld [vmem:[#allocation7 + $0x10] sm:$0xff]  ;;  %v339_v8 = vpack.c.bf16 %v149_v6, %v148_v5  ;;  %v151_v9 = vld [vmem:[#allocation7 + $0x18] sm:$0xff]  ;;  %v63_v10 = vld [vmem:[#allocation2] sm:$0xf] }
  0x39   :  { %v342_v11 = vpack.c.bf16 %v151_v9, %v150_v7  ;;  %v152_v12 = vld [vmem:[#allocation7 + $0x20] sm:$0xff]  ;;  %v153_v13 = vld [vmem:[#allocation7 + $0x28] sm:$0xff]  ;;  %v154_v15 = vld [vmem:[#allocation7 + $0x30] sm:$0xff] }
  0x3a   :  { %337 = vmatpush3.bf16.msra.mxu0 %v336_v4  ;;  %340 = vmatpush3.bf16.msra.mxu1 %v339_v8  ;;  %v345_v14 = vpack.c.bf16 %v153_v13, %v152_v12  ;;  %v155_v16 = vld [vmem:[#allocation7 + $0x38] sm:$0xff]  ;;  %v156_v18 = vld [vmem:[#allocation7 + $0x40] sm:$0xff]  ;;  %v157_v19 = vld [vmem:[#allocation7 + $0x48] sm:$0xff] }
  0x3b   :  { %341 = vmatprep.subr.bf16.mxu1 %v472_v0  ;;  %v348_v17 = vpack.c.bf16 %v155_v16, %v154_v15  ;;  %v351_v20 = vpack.c.bf16 %v157_v19, %v156_v18  ;;  %v158_v21 = vld [vmem:[#allocation7 + $0x50] sm:$0xff]  ;;  %v159_v22 = vld [vmem:[#allocation7 + $0x58] sm:$0xff]  ;;  %v160_v24 = vld [vmem:[#allocation7 + $0x60] sm:$0xff] }
  0x3c   :  { %v354_v23 = vpack.c.bf16 %v159_v22, %v158_v21  ;;  %v161_v25 = vld [vmem:[#allocation7 + $0x68] sm:$0xff]  ;;  %v162_v27 = vld [vmem:[#allocation7 + $0x70] sm:$0xff]  ;;  %v163_v28 = vld [vmem:[#allocation7 + $0x78] sm:$0xff] }
  0x3d   :  { %298 = vmatmul.mubr.msk.f32.vlgmr.msra.gmra.mrb[0].mxu0 %vm73_vm1, %v63_v10  ;;  %v357_v26 = vpack.c.bf16 %v161_v25, %v160_v24  ;;  %v360_v29 = vpack.c.bf16 %v163_v28, %v162_v27  ;;  %v269_v30 = vld [vmem:[%s576_s2] ss:$0 sm:$0xff]  ;;  %s475_s2 = smov [#allocation8]  }
  0x3e   :  { %343 = vmatpush3.bf16.msra.mxu1 %v342_v11  ;;  %v271_v39 = vld [vmem:[%s577_s3] ss:$0 sm:$0xff]  ;;  %s259_s14 = sshll.u32 %s475_s2, 4  ;;  %s260_s14 = int_to_ptr.vmem [resolvable:$true] %s259_s14 }
  0x3f   :  { %344 = vmatprep.subr.bf16.mxu1 %v472_v0  ;;  %v272_v41 = vld [vmem:[%s578_s4] ss:$0 sm:$0xff]  ;;  %s439_s15 = scalar_lea.vmem %s260_s14, 64  ;;  %p444_p11 = scmp.lt.s32.totalorder %s260_s14, %s260_s14 }
  0x40   :  { %p440_p10 = scmp.ne.s32.totalorder %s260_s14, %s439_s15  ;;  %p445_p12 = scmp.lt.s32.totalorder %s439_s15, %s439_s15 }
  0x42   :  { %346 = vmatpush3.bf16.msra.mxu1 %v345_v14  ;;  %p446_p13 = por %p445_p12, %p444_p11 }
  0x43   :  { %347 = vmatprep.subr.bf16.mxu1 %v472_v0 }
  0x44   :  { %p447_p0 = pnand %p446_p13, %p440_p10 }
  0x46   :  { %349 = vmatpush3.bf16.msra.mxu1 %v348_v17 }
  0x47   :  { %350 = vmatprep.subr.bf16.mxu1 %v472_v0 }
  0x4a   :  { %352 = vmatpush3.bf16.msra.mxu1 %v351_v20 }
  0x4b   :  { %353 = vmatprep.subr.bf16.mxu1 %v472_v0 }
  0x4e   :  { %355 = vmatpush3.bf16.msra.mxu1 %v354_v23 }
  0x4f   :  { %356 = vmatprep.subr.bf16.mxu1 %v472_v0 }
  0x52   :  { %358 = vmatpush3.bf16.msra.mxu1 %v357_v26 }
  0x53   :  { %359 = vmatprep.subr.bf16.mxu1 %v472_v0 }
  0x56   :  { %361 = vmatpush3.bf16.msra.mxu1 %v360_v29 }
 0x110   :  { %v143_v31 = vpop.f32.mrb[0].mxu0 }
 0x111   :  { %v144_v32 = vadd.f32 %v269_v30, %v143_v31  ;;  %v299_v33 = vpop.f32.mrb[1].mxu0 }
 0x113   :  { %v147_v34 = vmul.f32 %v144_v32, %v144_v32 }
 0x115   :  { %333 = vmatmul.mubr.f32.vlgmr.msra.gmra.mrb[0].mxu1 %v147_v34 }
 0x1e8   :  { %v230_v35 = vpop.f32.mrb[0].mxu1 }
 0x1e9   :  { %v231_v36 = vadd.f32 1e-12, %v230_v35  ;;  %v334_v37 = vpop.f32.mrb[1].mxu1 }
 0x1eb   :  { %371 = vrsqrt.f32 %v231_v36 }
 0x1f5   :  { %v372_v38 = vpop.eup %371 }
 0x1f6   :  { %v235_v40 = vmul.f32 %v372_v38, %v144_v32 }
 0x1f8   :  { %v243_v42 = vmul.f32 %v271_v39, %v235_v40 }
 0x1fa   :  { %v251_v43 = vadd.f32 %v272_v41, %v243_v42 }
 0x1fc   :  { %252 = vst [vmem:[#allocation8] sm:$0xf] %v251_v43 }
 0x1fd   :  { %450 = shalt.err (!%p447_p0)
}
 0x1fe   :  { %s451_s17 = scalar_lea.hbm %s580_s6, 64 }
 0x1ff   :  { %p452_p1 = scmp.ne.s32.totalorder %s580_s6, %s451_s17  ;;  %p455_p2 = scmp.lt.u32.totalorder %s451_s17, %s580_s6 }
 0x201   :  { %p457_p3 = pnand %p455_p2, %p452_p1 }
 0x203   :  { %460 = shalt.err (!%p457_p3)
}
 0x204   :  { %262 = dma.vmem_to_hbm [thread:$0]  %s260_s14, 64, %s580_s6, [#allocation4]  }
 0x205   :  { %465 = dma.done.wait [#allocation4], 64  }
 0x206   :  { %466 = vsyncadd [#allocation4], 4294967232 }
 0x207   :  { %266 = vsyncpa [#allocation3], 1 }
 0x208   :  { %267 = vsyncpa [#allocation6], 1 }
 0x209   :  { %268 = vsyncpa [#allocation4], 1 }

</bundles_post_ra>
